<compile_context>
chip_gen: v7x
topology: tpu7x:2x2x1
jax: 0.10.0
libtpu: 0.0.40
codegen_flags: <defaults>
</compile_context>

<pallas_src>
import functools
import math

import jax
import jax.numpy as jnp
from jax.experimental import pallas as pl
from jax.experimental.pallas import tpu as pltpu

LANE = 128
SUBLANE = 8


def _round_up(x, m):
    return (x + m - 1) // m * m


# ----------------------------------------------------------------------------
# Runtime feature / hardware probes (cached; run once).
# ----------------------------------------------------------------------------
@functools.lru_cache(maxsize=None)
def _pick_vmem_limit():
    """Generation-aware VMEM limit: ~3/4 of physical, clamped to [32, 96] MiB."""
    phys = 0
    try:
        info = pltpu.get_tpu_info()
        phys = int(getattr(info, "vmem_capacity_bytes", 0) or 0)
    except Exception:
        phys = 0
    if phys <= 0:
        phys = 64 * 1024 * 1024  # conservative fallback (v7x per-TC VMEM)
    return int(max(32 * 1024 * 1024, min(phys * 3 // 4, 96 * 1024 * 1024)))


@functools.lru_cache(maxsize=None)
def _single_buffer_supported():
    """Probe whether pipeline_mode=pl.Buffered(1) works on this JAX/Mosaic."""
    try:
        if not hasattr(pl, "Buffered"):
            return False

        def _probe(x_ref, o_ref):
            o_ref[...] = x_ref[...] + 1.0

        x = jnp.zeros((SUBLANE, LANE), jnp.float32)
        out = pl.pallas_call(
            _probe,
            out_shape=jax.ShapeDtypeStruct((2 * SUBLANE, LANE), jnp.float32),
            grid=(2,),
            in_specs=[pl.BlockSpec((SUBLANE, LANE), lambda i: (0, 0),
                                   pipeline_mode=pl.Buffered(1))],
            out_specs=pl.BlockSpec((SUBLANE, LANE), lambda i: (i, 0)),
        )(x)
        jax.block_until_ready(out)
        return True
    except Exception:
        return False


def _const_block_spec(shape):
    """BlockSpec for a grid-invariant (weights/bias) operand."""
    if _single_buffer_supported():
        return pl.BlockSpec(shape, lambda i: (0, 0), pipeline_mode=pl.Buffered(1))
    return pl.BlockSpec(shape, lambda i: (0, 0))


# ----------------------------------------------------------------------------
# Fused MLP kernel: all layers resident in VMEM, one grid step per row tile.
# ----------------------------------------------------------------------------
def _mlp_kernel(x_ref, *refs, num_layers):
    """refs = (w1, b1, w2, b2, ..., wL, bL, out_ref).  Weights are [K, N]."""
    o_ref = refs[-1]
    h = x_ref[...]
    for i in range(num_layers):
        w = refs[2 * i][...]
        b = refs[2 * i + 1][...]          # f32 [1, N]
        acc = jnp.dot(h.astype(w.dtype), w,
                      preferred_element_type=jnp.float32) + b
        if i < num_layers - 1:            # ReLU on all but the last layer
            acc = jnp.maximum(acc, 0.0)
            h = acc.astype(w.dtype)       # keep activations in param dtype
        else:
            h = acc
    o_ref[...] = h.astype(o_ref.dtype)


def _choose_tm(m_pad, padded_dims, *, x_itemsize, out_itemsize, param_itemsize,
               vmem_limit, single_buffered_weights):
    """Largest row tile (multiple of 8, <= 2048) whose working set fits VMEM."""
    weight_bytes = 0
    for k, n in zip(padded_dims[:-1], padded_dims[1:]):
        weight_bytes += k * n * param_itemsize + n * 4   # biases kept in f32
    if not single_buffered_weights:
        weight_bytes *= 2                                 # double-buffered consts

    d_in, n_out = padded_dims[0], padded_dims[-1]
    io_per_row = 2 * d_in * x_itemsize + 2 * n_out * out_itemsize  # dbl-buffered
    # Two largest consecutive layer widths are live across each matmul (f32).
    act_per_row = max(a + b for a, b in zip(padded_dims[:-1], padded_dims[1:])) * 4
    per_row = io_per_row + act_per_row

    headroom = 2 * 1024 * 1024
    avail = max(vmem_limit - weight_bytes - headroom, per_row * SUBLANE)
    tm = (avail // per_row) // SUBLANE * SUBLANE
    tm = max(SUBLANE, min(tm, 2048, m_pad))
    # Guarantee >= 2 grid steps when m allows, so v7x's 2nd TensorCore works.
    if m_pad >= 2 * SUBLANE:
        tm = min(tm, max(SUBLANE, (m_pad // 2) // SUBLANE * SUBLANE))
    return tm


def mlp_forward(x, prepared, *, out_dim):
    """Fused MLP forward.

    x        : [..., input_dim]
    prepared : list of (w [K_pad, N_pad], b [1, N_pad]); weights transposed and
               all layer widths zero-padded to multiples of 128 (except the
               first layer's K, which stays at input_dim so x is untouched).
    out_dim  : true output width (static); padded columns are sliced off.
    """
    num_layers = len(prepared)
    *lead, d_in = x.shape
    assert prepared[0][0].shape[0] == d_in
    m = int(math.prod(lead)) if lead else 1
    xf = x.reshape(m, d_in)

    padded_dims = [d_in] + [w.shape[1] for w, _ in prepared]
    n_pad = padded_dims[-1]               # lane-dense output width

    vmem_limit = _pick_vmem_limit()
    single_buf = _single_buffer_supported()

    m_pad = _round_up(m, SUBLANE)
    tm = _choose_tm(
        m_pad, padded_dims,
        x_itemsize=x.dtype.itemsize,
        out_itemsize=x.dtype.itemsize,
        param_itemsize=prepared[0][0].dtype.itemsize,
        vmem_limit=vmem_limit,
        single_buffered_weights=single_buf,
    )
    m_pad = _round_up(m_pad, tm)
    if m_pad != m:
        xf = jnp.pad(xf, ((0, m_pad - m), (0, 0)))

    in_specs = [pl.BlockSpec((tm, d_in), lambda i: (i, 0))]
    operands = [xf]
    for w, b in prepared:
        k, n = w.shape
        in_specs.append(_const_block_spec((k, n)))   # weight, grid-invariant
        in_specs.append(_const_block_spec((1, n)))   # bias,   grid-invariant
        operands += [w, b]

    out = pl.pallas_call(
        functools.partial(_mlp_kernel, num_layers=num_layers),
        out_shape=jax.ShapeDtypeStruct((m_pad, n_pad), x.dtype),
        grid=(m_pad // tm,),
        in_specs=in_specs,
        out_specs=pl.BlockSpec((tm, n_pad), lambda i: (i, 0)),
        compiler_params=pltpu.CompilerParams(
            dimension_semantics=("parallel",),
            vmem_limit_bytes=vmem_limit,
        ),
    )(*operands)

    return out[:m, :out_dim].reshape(*lead, out_dim)


# ----------------------------------------------------------------------------
# Parameters: PyTorch layout at init, pre-transposed/padded once for the kernel.
# ----------------------------------------------------------------------------
def init_mlp_params(key, input_dim, hidden_dim, output_dim, num_layers):
    """PyTorch nn.Linear layout: list of (weight [out, in], bias [out])."""
    h = [hidden_dim] * (num_layers - 1)
    dims_in = [input_dim] + h
    dims_out = h + [output_dim]
    params = []
    keys = jax.random.split(key, num_layers)
    for kk, n_in, n_out in zip(keys, dims_in, dims_out):
        kw, kb = jax.random.split(kk)
        bound = 1.0 / math.sqrt(n_in)
        w = jax.random.uniform(kw, (n_out, n_in), jnp.float32, -bound, bound)
        b = jax.random.uniform(kb, (n_out,), jnp.float32, -bound, bound)
        params.append((w, b))
    return params


def prepare_params(raw_params, param_dtype=jnp.float32):
    """Pre-transpose weights to [K, N] and zero-pad every layer width to a
    multiple of 128 (first layer's K stays = input_dim so x is untouched).
    Done once, outside jit.  param_dtype=jnp.bfloat16 enables the bf16 MXU
    path (weights + inter-layer activations in bf16, f32 accumulation)."""
    prepared = []
    prev_n_pad = None
    for i, (w, b) in enumerate(raw_params):
        w = jnp.asarray(w, jnp.float32)
        b = jnp.asarray(b, jnp.float32)
        n_out, n_in = w.shape
        k_pad = n_in if i == 0 else prev_n_pad
        n_pad = _round_up(n_out, LANE)
        wt = jnp.zeros((k_pad, n_pad), jnp.float32).at[:n_in, :n_out].set(w.T)
        bb = jnp.zeros((1, n_pad), jnp.float32).at[0, :n_out].set(b)
        prepared.append((wt.astype(param_dtype), bb))    # bias stays f32
        prev_n_pad = n_pad
    return prepared


def mlp_forward_ref(x, raw_params):
    """Pure-JAX reference with identical semantics to the PyTorch module."""
    h = x
    n = len(raw_params)
    for i, (w, b) in enumerate(raw_params):
        h = h @ w.T + b
        if i < n - 1:
            h = jax.nn.relu(h)
    return h


# ----------------------------------------------------------------------------
if __name__ == "__main__":
    # DETR-style bbox-head MLP: MLP(d_model, d_model, 4, 3); x is [B, Q, C].
    input_dim, hidden_dim, output_dim, num_layers = 32, 32, 4, 3
    B, Q = 2, 8

    key = jax.random.PRNGKey(0)
    kx, kp = jax.random.split(key)
    x = jax.random.normal(kx, (B, Q, input_dim), jnp.float32)
    raw = init_mlp_params(kp, input_dim, hidden_dim, output_dim, num_layers)
    prepared = prepare_params(raw)            # transpose + pad ONCE, outside jit

    fwd = jax.jit(functools.partial(mlp_forward, out_dim=output_dim))
    out = jax.block_until_ready(fwd(x, prepared))
    ref = mlp_forward_ref(x, raw)

    assert out.shape == (B, Q, output_dim)
    assert bool(jnp.all(jnp.isfinite(out)))
    assert jnp.allclose(out, ref, atol=1e-5, rtol=1e-5), float(
        jnp.max(jnp.abs(out - ref)))
    print("KERNEL_OK")
</pallas_src>

<mosaic_0001>
module attributes {stable_mosaic.version = 11 : i64} {
  func.func @_mlp_kernel(%arg0: i32, %arg1: memref<8x32xf32, #tpu.memory_space<vmem>>, %arg2: memref<32x128xf32, #tpu.memory_space<vmem>>, %arg3: memref<1x128xf32, #tpu.memory_space<vmem>>, %arg4: memref<128x128xf32, #tpu.memory_space<vmem>>, %arg5: memref<1x128xf32, #tpu.memory_space<vmem>>, %arg6: memref<128x128xf32, #tpu.memory_space<vmem>>, %arg7: memref<1x128xf32, #tpu.memory_space<vmem>>, %arg8: memref<8x128xf32, #tpu.memory_space<vmem>>) attributes {dimension_semantics = [#tpu.dimension_semantics<parallel>], iteration_bounds = array<i64: 2>, scalar_prefetch = 0 : i64, scratch_operands = 0 : i64, tpu.core_type = #tpu.core_type<tc>, window_params = [{transform_indices = @transform_0, window_bounds = array<i64: 8, 32>}, {pipeline_mode = #tpu.pipeline_mode<synchronous>, transform_indices = @transform_1, window_bounds = array<i64: 32, 128>}, {pipeline_mode = #tpu.pipeline_mode<synchronous>, transform_indices = @transform_2, window_bounds = array<i64: 1, 128>}, {pipeline_mode = #tpu.pipeline_mode<synchronous>, transform_indices = @transform_3, window_bounds = array<i64: 128, 128>}, {pipeline_mode = #tpu.pipeline_mode<synchronous>, transform_indices = @transform_4, window_bounds = array<i64: 1, 128>}, {pipeline_mode = #tpu.pipeline_mode<synchronous>, transform_indices = @transform_5, window_bounds = array<i64: 128, 128>}, {pipeline_mode = #tpu.pipeline_mode<synchronous>, transform_indices = @transform_6, window_bounds = array<i64: 1, 128>}, {transform_indices = @transform_7, window_bounds = array<i64: 8, 128>}]} {
    %c0 = arith.constant 0 : index
    %c0_0 = arith.constant 0 : index
    %0 = vector.load %arg1[%c0, %c0_0] : memref<8x32xf32, #tpu.memory_space<vmem>>, vector<8x32xf32>
    %c0_1 = arith.constant 0 : index
    %c0_2 = arith.constant 0 : index
    %1 = vector.load %arg2[%c0_1, %c0_2] : memref<32x128xf32, #tpu.memory_space<vmem>>, vector<32x128xf32>
    %c0_3 = arith.constant 0 : index
    %c0_4 = arith.constant 0 : index
    %2 = vector.load %arg3[%c0_3, %c0_4] : memref<1x128xf32, #tpu.memory_space<vmem>>, vector<1x128xf32>
    %cst = arith.constant dense<0.000000e+00> : vector<8x128xf32>
    %3 = tpu.matmul %0, %1, %cst {dimension_numbers = #tpu.dot_dimension_numbers<[1], [0], [0], [1], [0, 0, 1, 1], [], []>} : vector<8x32xf32>, vector<32x128xf32>, vector<8x128xf32> -> vector<8x128xf32>
    %4 = vector.broadcast %2 : vector<1x128xf32> to vector<8x128xf32>
    %5 = arith.addf %3, %4 : vector<8x128xf32>
    %cst_5 = arith.constant 0.000000e+00 : f32
    %6 = vector.broadcast %cst_5 : f32 to vector<8x128xf32>
    %7 = arith.maximumf %5, %6 : vector<8x128xf32>
    %c0_6 = arith.constant 0 : index
    %c0_7 = arith.constant 0 : index
    %8 = vector.load %arg4[%c0_6, %c0_7] : memref<128x128xf32, #tpu.memory_space<vmem>>, vector<128x128xf32>
    %c0_8 = arith.constant 0 : index
    %c0_9 = arith.constant 0 : index
    %9 = vector.load %arg5[%c0_8, %c0_9] : memref<1x128xf32, #tpu.memory_space<vmem>>, vector<1x128xf32>
    %cst_10 = arith.constant dense<0.000000e+00> : vector<8x128xf32>
    %10 = tpu.matmul %7, %8, %cst_10 {dimension_numbers = #tpu.dot_dimension_numbers<[1], [0], [0], [1], [0, 0, 1, 1], [], []>} : vector<8x128xf32>, vector<128x128xf32>, vector<8x128xf32> -> vector<8x128xf32>
    %11 = vector.broadcast %9 : vector<1x128xf32> to vector<8x128xf32>
    %12 = arith.addf %10, %11 : vector<8x128xf32>
    %cst_11 = arith.constant 0.000000e+00 : f32
    %13 = vector.broadcast %cst_11 : f32 to vector<8x128xf32>
    %14 = arith.maximumf %12, %13 : vector<8x128xf32>
    %c0_12 = arith.constant 0 : index
    %c0_13 = arith.constant 0 : index
    %15 = vector.load %arg6[%c0_12, %c0_13] : memref<128x128xf32, #tpu.memory_space<vmem>>, vector<128x128xf32>
    %c0_14 = arith.constant 0 : index
    %c0_15 = arith.constant 0 : index
    %16 = vector.load %arg7[%c0_14, %c0_15] : memref<1x128xf32, #tpu.memory_space<vmem>>, vector<1x128xf32>
    %cst_16 = arith.constant dense<0.000000e+00> : vector<8x128xf32>
    %17 = tpu.matmul %14, %15, %cst_16 {dimension_numbers = #tpu.dot_dimension_numbers<[1], [0], [0], [1], [0, 0, 1, 1], [], []>} : vector<8x128xf32>, vector<128x128xf32>, vector<8x128xf32> -> vector<8x128xf32>
    %18 = vector.broadcast %16 : vector<1x128xf32> to vector<8x128xf32>
    %19 = arith.addf %17, %18 : vector<8x128xf32>
    %c0_17 = arith.constant 0 : index
    %c0_18 = arith.constant 0 : index
    %20 = vector.load %arg8[%c0_17, %c0_18] : memref<8x128xf32, #tpu.memory_space<vmem>>, vector<8x128xf32>
    tpu.vector_store %arg8[%c0_17, %c0_18], %19 {strides = array<i32>} : memref<8x128xf32, #tpu.memory_space<vmem>>, vector<8x128xf32>,
    return
  }
  func.func @transform_0(%arg0: i32) -> (i32, i32) {
    %c0_i32 = arith.constant 0 : i32
    %c0_i32_0 = arith.constant 0 : i32
    return %arg0, %c0_i32 : i32, i32
  }
  func.func @transform_1(%arg0: i32) -> (i32, i32) {
    %c0_i32 = arith.constant 0 : i32
    %c0_i32_0 = arith.constant 0 : i32
    %c0_i32_1 = arith.constant 0 : i32
    return %c0_i32, %c0_i32_0 : i32, i32
  }
  func.func @transform_2(%arg0: i32) -> (i32, i32) {
    %c0_i32 = arith.constant 0 : i32
    %c0_i32_0 = arith.constant 0 : i32
    %c0_i32_1 = arith.constant 0 : i32
    return %c0_i32, %c0_i32_0 : i32, i32
  }
  func.func @transform_3(%arg0: i32) -> (i32, i32) {
    %c0_i32 = arith.constant 0 : i32
    %c0_i32_0 = arith.constant 0 : i32
    %c0_i32_1 = arith.constant 0 : i32
    return %c0_i32, %c0_i32_0 : i32, i32
  }
  func.func @transform_4(%arg0: i32) -> (i32, i32) {
    %c0_i32 = arith.constant 0 : i32
    %c0_i32_0 = arith.constant 0 : i32
    %c0_i32_1 = arith.constant 0 : i32
    return %c0_i32, %c0_i32_0 : i32, i32
  }
  func.func @transform_5(%arg0: i32) -> (i32, i32) {
    %c0_i32 = arith.constant 0 : i32
    %c0_i32_0 = arith.constant 0 : i32
    %c0_i32_1 = arith.constant 0 : i32
    return %c0_i32, %c0_i32_0 : i32, i32
  }
  func.func @transform_6(%arg0: i32) -> (i32, i32) {
    %c0_i32 = arith.constant 0 : i32
    %c0_i32_0 = arith.constant 0 : i32
    %c0_i32_1 = arith.constant 0 : i32
    return %c0_i32, %c0_i32_0 : i32, i32
  }
  func.func @transform_7(%arg0: i32) -> (i32, i32) {
    %c0_i32 = arith.constant 0 : i32
    %c0_i32_0 = arith.constant 0 : i32
    return %arg0, %c0_i32 : i32, i32
  }
}

</mosaic_0001>

<bundles_post_ra>
// kernel: mlp_forward.1
= control target key start
LH: loop header
LB: loop body
LE: loop exit
PB: predicated region body
PF: predicated region fallthrough
CT: control target
= control target key end

     0   :  { %12 = vsyncpa [#allocation3], 0  ;;  %s1431_s0 = inlined_call_operand.hbm [shape: f32[16,32], index: 0, kind: input, shape index: {}]   ;;  %s1432_s1 = inlined_call_operand.hbm [shape: f32[32,128], index: 1, kind: input, shape index: {}]   ;;  %s1433_s2 = inlined_call_operand.vmem [shape: f32[1,128], index: 2, kind: input, shape index: {}]   ;;  %s1434_s3 = inlined_call_operand.hbm [shape: f32[128,128], index: 3, kind: input, shape index: {}]   ;;  %s1435_s4 = inlined_call_operand.vmem [shape: f32[1,128], index: 4, kind: input, shape index: {}]   ;;  %s1436_s5 = inlined_call_operand.hbm [shape: f32[128,128], index: 5, kind: input, shape index: {}]   ;;  %s1437_s6 = inlined_call_operand.vmem [shape: f32[1,128], index: 6, kind: input, shape index: {}]   ;;  %s1438_s7 = inlined_call_operand.vmem [shape: f32[16,128], index: 7, kind: output, shape index: {}]  }
   0x1   :  { %14 = vsyncpa [#allocation3 + $0x1], 0 }
   0x2   :  { %15 = vsyncpa [#allocation5], 0 }
   0x3   :  { %16 = vsyncpa [#allocation8], 0  ;;  %s1183_s24 = smov 0   ;;  %s1185_s25 = smov 0  }
   0x4   :  { %s1187_s26 = smov 0   ;;  %s1189_s27 = smov 0  }
   0x5 LB: > { %s1202_s28 = sadd.s32 4294967295, %s1132_s27   ;;  %p42_p0 = scmp.ne.s32.totalorder %s1124_s25, %s1120_s24  ;;  %s1132_s27 = sphi %s1189_s27, %s1456_s27   ;;  %s1128_s26 = sphi %s1187_s26, %s1455_s26   ;;  %s1124_s25 = sphi %s1185_s25, %s1454_s25   ;;  %s1120_s24 = sphi %s1183_s24, %s1453_s24  }
   0x6   : > { %p1439_p1 = scmp.eq.s32.totalorder %s1202_s28, 0  ;;  %p708_p2 = scmp.ge.s32.totalorder %s1132_s27, 1 }
   0x7   : > { %p205_p3 = scmp.lt.s32.totalorder %s1132_s27, 3  ;;  %s1134_s8 = smov [#allocation4]  }
   0x8   : > { %p1210_p4 = por %p1439_p1, %p42_p0  ;;  %s217_s9 = sshll.u32 %s1134_s8, 4  ;;  %s1218_s9 = int_to_ptr.vmem [resolvable:$true] %s217_s9 }
   0x9   : > { %p1214_p5 = pnand %p708_p2, %p205_p3  ;;  %s1135_s11 = smov [#allocation6]  }
   0xa   : > { %s1442_s29 = scalar_select %p1210_p4, 1, 0 }
   0xb   : > { %s1443_s30 = scalar_select %p1214_p5, 1, 0 }
   0xc   : > { %p915_p6 = pneg %p1214_p5  ;;  %s233_s12 = sshll.u32 %s1135_s11, 4  ;;  %s1228_s12 = int_to_ptr.vmem [resolvable:$true] %s233_s12 }
   0xd   : > { %s1136_s13 = smov [#allocation7]   ;;  %s976_s17 = scalar_lea.hbm %s1432_s1, 512 }
   0xe   : > { %p1224_p7 = pnand %p915_p6, %p1439_p1  ;;  %s1230_s14 = sshll.u32 %s1136_s13, 4  ;;  %s250_s14 = int_to_ptr.vmem [resolvable:$true] %s1230_s14 }
   0xf   : > { %p977_p8 = scmp.ne.s32.totalorder %s1432_s1, %s976_s17  ;;  %p983_p12 = scmp.lt.u32.totalorder %s976_s17, %s1432_s1 }
  0x10   : > { %p1240_p9 = pneg %p1224_p7 }
  0x12   : > { %p979_p10 = pnand %p1240_p9, %p977_p8 }
  0x14   : > { %p980_p11 = pneg %p979_p10 }
  0x16   : > { %p985_p13 = pnand %p983_p12, %p980_p11 }
  0x18   : > { %988 = shalt.err (!%p985_p13)
}
  0x19   : > { %s989_s23 = scalar_lea.vmem %s1218_s9, 512  ;;  %p997_p6 = scmp.lt.s32.totalorder %s1218_s9, %s1218_s9 }
  0x1a   : > { %p990_p0 = scmp.ne.s32.totalorder %s1218_s9, %s989_s23  ;;  %p998_p1 = scmp.lt.s32.totalorder %s989_s23, %s989_s23 }
  0x1c   : > { %p992_p2 = pnand %p990_p0, %p1240_p9  ;;  %p999_p8 = por %p998_p1, %p997_p6 }
  0x1e   : > { %p993_p3 = pneg %p992_p2 }
  0x20   : > { %p1000_p10 = pnand %p999_p8, %p993_p3 }
  0x22   : > { %1003 = shalt.err (!%p1000_p10)
}
  0x23   : > { %s1137_s24 = smov 128   ;;  %s1138_s8 = smov 8  }
  0x24   : > { %918 = dma.hbm_to_vmem [thread:$0]  (!%p1224_p7), %s1432_s1, 512, %s1218_s9, [#allocation5], %s1137_s24, %s1137_s24, %s1138_s8  }
  0x25   : > { %s1004_s17 = scalar_lea.hbm %s1434_s3, 2048 }
  0x26   : > { %p1005_p1 = scmp.ne.s32.totalorder %s1434_s3, %s1004_s17  ;;  %p1011_p13 = scmp.lt.u32.totalorder %s1004_s17, %s1434_s3 }
  0x28   : > { %p1007_p11 = pnand %p1005_p1, %p1240_p9 }
  0x2a   : > { %p1008_p12 = pneg %p1007_p11 }
  0x2c   : > { %p1013_p0 = pnand %p1011_p13, %p1008_p12 }
  0x2e   : > { %1016 = shalt.err (!%p1013_p0)
}
  0x2f   : > { %s1017_s9 = scalar_lea.vmem %s1228_s12, 2048  ;;  %p1025_p8 = scmp.lt.s32.totalorder %s1228_s12, %s1228_s12 }
  0x30   : > { %p1018_p2 = scmp.ne.s32.totalorder %s1228_s12, %s1017_s9  ;;  %p1026_p10 = scmp.lt.s32.totalorder %s1017_s9, %s1017_s9 }
  0x32   : > { %p1020_p3 = pnand %p1018_p2, %p1240_p9  ;;  %p1027_p1 = por %p1026_p10, %p1025_p8 }
  0x34   : > { %p1021_p6 = pneg %p1020_p3 }
  0x36   : > { %p1028_p11 = pnand %p1027_p1, %p1021_p6 }
  0x38   : > { %1031 = shalt.err (!%p1028_p11)
}
  0x39   : > { %921 = dma.hbm_to_vmem [thread:$0]  (!%p1224_p7), %s1434_s3, 2048, %s1228_s12, [#allocation5], %s1137_s24, %s1137_s24, %s1138_s8  }
  0x3a   : > { %s1032_s16 = scalar_lea.hbm %s1436_s5, 2048 }
  0x3b   : > { %p1033_p12 = scmp.ne.s32.totalorder %s1436_s5, %s1032_s16  ;;  %p1039_p2 = scmp.lt.u32.totalorder %s1032_s16, %s1436_s5 }
  0x3d   : > { %p1035_p13 = pnand %p1033_p12, %p1240_p9 }
  0x3f   : > { %p1036_p0 = pneg %p1035_p13 }
  0x41   : > { %p1041_p3 = pnand %p1039_p2, %p1036_p0 }
  0x43   : > { %1044 = shalt.err (!%p1041_p3)
}
  0x44   : > { %s1045_s22 = scalar_lea.vmem %s250_s14, 2048  ;;  %p1053_p1 = scmp.lt.s32.totalorder %s250_s14, %s250_s14 }
  0x45   : > { %p1046_p6 = scmp.ne.s32.totalorder %s250_s14, %s1045_s22  ;;  %p1054_p11 = scmp.lt.s32.totalorder %s1045_s22, %s1045_s22 }
  0x47   : > { %p1048_p8 = pnand %p1046_p6, %p1240_p9  ;;  %p1055_p4 = por %p1054_p11, %p1053_p1 }
  0x49   : > { %p1049_p10 = pneg %p1048_p8 }
  0x4b   : > { %p1056_p5 = pnand %p1055_p4, %p1049_p10 }
  0x4d   : > { %1059 = shalt.err (!%p1056_p5)
}
  0x4e   : > { %924 = dma.hbm_to_vmem [thread:$0]  (!%p1224_p7), %s1436_s5, 2048, %s250_s14, [#allocation8], %s1137_s24, %s1137_s24, %s1138_s8  }
  0x4f   : > { %s1313_s20 = sadd.s32 1, %s1132_s27   ;;  %s29_s23 = sadd.s32 1, %s1128_s26 }
  0x50   : > { %s26_s10 = ssub.s32 %s1132_s27, %s1313_s20  ;;  %p36_p5 = scmp.ne.s32.totalorder %s1128_s26, %s1124_s25 }
  0x51   : > { %p27_p4 = scmp.eq.s32.totalorder %s26_s10, 0  ;;  %p37_p9 = scmp.eq.s32.totalorder %s1132_s27, 0 }
  0x52   : > { %p932_p12 = scmp.lt.s32.totalorder %s1132_s27, 2  ;;  %s266_s13 = sand.u32 1, %s1128_s26  }
  0x53   : > { %s1323_s11 = scalar_select %p27_p4, %s1128_s26, %s29_s23  }
  0x54   : > { %p38_p13 = por %p37_p9, %p36_p5  ;;  %s713_s15 = sshll.u32 %s266_s13, 3 }
  0x55   : > { %s714_s16 = sshll.u32 %s1132_s27, 7  ;;  %s270_s14 = scalar_lea.vmem [#allocation2], %s713_s15 }
  0x56   : > { %s1330_s19 = scalar_lea.hbm %s1431_s0, %s714_s16  ;;  %s277_s24 = sshll.u32 %s270_s14, 4  ;;  %s1332_s24 = int_to_ptr.vmem [resolvable:$true] %s277_s24 }
  0x57   : > { %p1334_p7 = pnand %p932_p12, %p38_p13  ;;  %s267_s27 = scalar_lea.sflag [#allocation3], %s266_s13 }
  0x58   : > { %s1060_s21 = scalar_lea.hbm %s1330_s19, 128  ;;  %s1065_s9 = scalar_lea.hbm %s1431_s0, 256 }
  0x59   : > { %p1061_p0 = scmp.ne.s32.totalorder %s1330_s19, %s1060_s21  ;;  %p1062_p2 = pneg %p1334_p7 }
  0x5a   : > { %p1066_p8 = scmp.lt.u32.totalorder %s1330_s19, %s1431_s0  ;;  %p1067_p10 = scmp.lt.u32.totalorder %s1065_s9, %s1060_s21 }
  0x5b   : > { %p1063_p3 = pnand %p1062_p2, %p1061_p0  ;;  %p1069_p11 = scmp.lt.u32.totalorder %s1060_s21, %s1330_s19 }
  0x5c   : > { %p1068_p1 = por %p1067_p10, %p1066_p8 }
  0x5d   : > { %p1064_p6 = pneg %p1063_p3 }
  0x5e   : > { %p1070_p4 = por %p1069_p11, %p1068_p1 }
  0x60   : > { %p1071_p5 = pnand %p1070_p4, %p1064_p6 }
  0x62   : > { %1074 = shalt.err (!%p1071_p5)
}
  0x63   : > { %s1075_s13 = scalar_lea.vmem %s1332_s24, 128  ;;  %s1139_s15 = smov [#allocation2]  }
  0x64   : > { %p1076_p9 = scmp.ne.s32.totalorder %s1332_s24, %s1075_s13  ;;  %s1080_s16 = sshll.u32 %s1139_s15, 4  ;;  %s1081_s16 = int_to_ptr.vmem [resolvable:$false] %s1080_s16 }
  0x65   : > { %s1082_s17 = scalar_lea.vmem %s1081_s16, 256  ;;  %p1083_p0 = scmp.lt.s32.totalorder %s1332_s24, %s1081_s16 }
  0x66   : > { %p1078_p12 = pnand %p1076_p9, %p1062_p2  ;;  %p1084_p3 = scmp.lt.s32.totalorder %s1082_s17, %s1075_s13 }
  0x68   : > { %p1079_p13 = pneg %p1078_p12  ;;  %p1085_p8 = por %p1084_p3, %p1083_p0 }
  0x6a   : > { %p1086_p10 = pnand %p1085_p8, %p1079_p13 }
  0x6c   : > { %1089 = shalt.err (!%p1086_p10)
}
  0x6d   : > { %928 = dma.hbm_to_vmem [thread:$0]  (!%p1334_p7), %s1330_s19, 128, %s1332_s24, %s267_s27  }
  0x6e   : > { %p1447_p6 = scmp.ne.s32.totalorder %s1443_s30, 0 }
  0x6f   : > { %s288_s18 = sand.u32 (!%p1447_p6), 1, %s1124_s25   ;;  %p1448_p2 = scmp.ne.s32.totalorder (!%p1447_p6), %s1442_s29, 0 }
  0x70   : > { %286 = sbr.rel (%p1447_p6) target bundleno = 783 (0x30f), region = 48  ;;  %s1366_s14 = sshll.u32 (!%p1447_p6), %s288_s18, 3 }
  0x71   : > { %s289_s21 = scalar_lea.sflag (!%p1447_p6), [#allocation3], %s288_s18  ;;  %s292_s22 = scalar_lea.vmem (!%p1447_p6), [#allocation2], %s1366_s14 }
  0x77   : > { %1107 = dma.done.wait (%p1448_p2), %s289_s21, 128  }
  0x78   : > { %1109 = vsyncadd (%p1448_p2), %s289_s21, 4294967168  ;;  %p1449_p1 = scmp.eq.s32.totalorder %s1202_s28, 0 }
  0x7a   : > { %1111 = dma.done.wait (%p1449_p1), [#allocation5], 2560   ;;  %p1450_p7 = pmov %p1449_p1 }
  0x7b   : > { %p1451_p11 = pmov %p1449_p1 }
  0x7c   : > { %1113 = vsyncadd (%p1450_p7), [#allocation5], 4294964736 }
  0x7d   : > { %1115 = dma.done.wait (%p1451_p11), [#allocation8], 2048   ;;  %p1452_p4 = pmov %p1449_p1 }
  0x7e   : > { %v1140_v0 = vmov 0.0|0.0   ;;  %vm1141_vm0 = vmmov 0   ;;  %v1142_v1 = vmov 0.0   ;;  %v339_v2 = vld [vmem:[#allocation4] sm:$0xff]  ;;  %v340_v3 = vld [vmem:[#allocation4 + $0x8] sm:$0xff]  ;;  %v341_v4 = vld [vmem:[#allocation4 + $0x10] sm:$0xff] }
  0x7f   : > { %1117 = vsyncadd (%p1452_p4), [#allocation8], 4294965248  ;;  %847 = vmatprep.subr.bf16.mxu0 %v1140_v0  ;;  %774 = vmatprep.mubr.msk.f32.mxu0 %vm1141_vm0, %v1142_v1  ;;  %v848_v5 = vpack.c.bf16 %v340_v3, %v339_v2  ;;  %v342_v6 = vld [vmem:[#allocation4 + $0x18] sm:$0xff]  ;;  %v425_v7 = vld [vmem:[#allocation6] sm:$0xff]  ;;  %vm350_vm1 = vcmask 261120   ;;  %p334_p5 = scmp.lt.s32.totalorder %s1202_s28, 1 }
  0x80   : > { %853 = vmatprep.subr.bf16.mxu1 %v1140_v0  ;;  %809 = vmatprep.mubr.msk.f32.mxu1 %vm1141_vm0, %v1142_v1  ;;  %v426_v8 = vld [vmem:[#allocation6 + $0x8] sm:$0xff]  ;;  %v427_v9 = vld [vmem:[#allocation6 + $0x10] sm:$0xff]  ;;  %v428_v10 = vld [vmem:[#allocation6 + $0x18] sm:$0xff]  ;;  %v851_v11 = vpack.c.bf16 %v342_v6, %v341_v4 }
  0x81   : > { %849 = vmatpush3.bf16.msra.mxu0 %v848_v5  ;;  %v854_v12 = vpack.c.bf16 %v426_v8, %v425_v7  ;;  %v857_v13 = vpack.c.bf16 %v428_v10, %v427_v9  ;;  %v429_v14 = vld [vmem:[#allocation6 + $0x20] sm:$0xff]  ;;  %v430_v15 = vld [vmem:[#allocation6 + $0x28] sm:$0xff]  ;;  %v338_v16 = vld [vmem:[%s292_s22] sm:$0xff]  ;;  %s1458_s28 = smov (!%p334_p5, %s1202_s28), 1 }
  0x82   : > { %850 = vmatprep.subr.bf16.mxu0 %v1140_v0  ;;  %v860_v17 = vpack.c.bf16 %v430_v15, %v429_v14  ;;  %v431_v18 = vld [vmem:[#allocation6 + $0x30] sm:$0xff]  ;;  %v432_v19 = vld [vmem:[#allocation6 + $0x38] sm:$0xff]  ;;  %v433_v21 = vld [vmem:[#allocation6 + $0x40] sm:$0xff]  ;;  %s720_s8 = sshll.u32 %s1458_s28, 3 }
  0x83   : > { %855 = vmatpush3.bf16.msra.mxu1 %v854_v12  ;;  %v863_v20 = vpack.c.bf16 %v432_v19, %v431_v18  ;;  %v434_v22 = vld [vmem:[#allocation6 + $0x48] sm:$0xff]  ;;  %v435_v24 = vld [vmem:[#allocation6 + $0x50] sm:$0xff]  ;;  %v436_v25 = vld [vmem:[#allocation6 + $0x58] sm:$0xff]  ;;  %s337_s23 = scalar_lea.vmem %s1438_s7, %s720_s8 }
  0x84   : > { %856 = vmatprep.subr.bf16.mxu1 %v1140_v0  ;;  %v866_v23 = vpack.c.bf16 %v434_v22, %v433_v21  ;;  %v869_v26 = vpack.c.bf16 %v436_v25, %v435_v24  ;;  %v437_v27 = vld [vmem:[#allocation6 + $0x60] sm:$0xff]  ;;  %v438_v28 = vld [vmem:[#allocation6 + $0x68] sm:$0xff]  ;;  %v439_v30 = vld [vmem:[#allocation6 + $0x70] sm:$0xff] }
  0x85   : > { %852 = vmatpush3.bf16.msra.mxu0 %v851_v11  ;;  %v872_v29 = vpack.c.bf16 %v438_v28, %v437_v27  ;;  %v440_v31 = vld [vmem:[#allocation6 + $0x78] sm:$0xff]  ;;  %v519_v33 = vld [vmem:[#allocation7] sm:$0xff]  ;;  %v520_v34 = vld [vmem:[#allocation7 + $0x8] sm:$0xff] }
  0x86   : > { %877 = vmatprep.subr.bf16.mxu0 %v1140_v0  ;;  %v875_v32 = vpack.c.bf16 %v440_v31, %v439_v30  ;;  %v521_v35 = vld [vmem:[#allocation7 + $0x10] sm:$0xff]  ;;  %v878_v36 = vpack.c.bf16 %v520_v34, %v519_v33  ;;  %v522_v37 = vld [vmem:[#allocation7 + $0x18] sm:$0xff]  ;;  %v523_v39 = vld [vmem:[#allocation7 + $0x20] sm:$0xff] }
  0x87   : > { %858 = vmatpush3.bf16.msra.mxu1 %v857_v13  ;;  %v881_v38 = vpack.c.bf16 %v522_v37, %v521_v35  ;;  %v524_v40 = vld [vmem:[#allocation7 + $0x28] sm:$0xff]  ;;  %v525_v42 = vld [vmem:[#allocation7 + $0x30] sm:$0xff]  ;;  %v526_v43 = vld [vmem:[#allocation7 + $0x38] sm:$0xff] }
  0x88   : > { %775 = vmatmul.mubr.msk.f32.vlgmr.msra.gmra.mrb[0].mxu0 %vm350_vm1, %v338_v16  ;;  %859 = vmatprep.subr.bf16.mxu1 %v1140_v0  ;;  %v884_v41 = vpack.c.bf16 %v524_v40, %v523_v39  ;;  %v887_v44 = vpack.c.bf16 %v526_v43, %v525_v42  ;;  %v527_v45 = vld [vmem:[#allocation7 + $0x40] sm:$0xff]  ;;  %v528_v46 = vld [vmem:[#allocation7 + $0x48] sm:$0xff]  ;;  %v529_v48 = vld [vmem:[#allocation7 + $0x50] sm:$0xff] }
  0x89   : > { %844 = vmatprep.mubr.msk.f32.mxu0 %vm1141_vm0, %v1142_v1  ;;  %879 = vmatpush3.bf16.msra.mxu0 %v878_v36  ;;  %v890_v47 = vpack.c.bf16 %v528_v46, %v527_v45  ;;  %v530_v49 = vld [vmem:[#allocation7 + $0x58] sm:$0xff]  ;;  %v531_v51 = vld [vmem:[#allocation7 + $0x60] sm:$0xff]  ;;  %v532_v52 = vld [vmem:[#allocation7 + $0x68] sm:$0xff] }
  0x8a   : > { %880 = vmatprep.subr.bf16.mxu0 %v1140_v0  ;;  %v893_v50 = vpack.c.bf16 %v530_v49, %v529_v48  ;;  %v896_v53 = vpack.c.bf16 %v532_v52, %v531_v51  ;;  %v721_v54 = vld [vmem:[%s1433_s2] ss:$0 sm:$0xff]  ;;  %v534_v60 = vld [vmem:[#allocation7 + $0x78] sm:$0xff] }
  0x8b   : > { %861 = vmatpush3.bf16.msra.mxu1 %v860_v17  ;;  %v533_v59 = vld [vmem:[#allocation7 + $0x70] sm:$0xff] }
  0x8c   : > { %862 = vmatprep.subr.bf16.mxu1 %v1140_v0  ;;  %v899_v61 = vpack.c.bf16 %v534_v60, %v533_v59  ;;  %v723_v62 = vld [vmem:[%s1435_s4] ss:$0 sm:$0xff] }
  0x8d   : > { %882 = vmatpush3.bf16.msra.mxu0 %v881_v38  ;;  %v724_v3 = vld [vmem:[%s1437_s6] ss:$0 sm:$0xff] }
  0x8e   : > { %883 = vmatprep.subr.bf16.mxu0 %v1140_v0 }
  0x8f   : > { %864 = vmatpush3.bf16.msra.mxu1 %v863_v20 }
  0x90   : > { %865 = vmatprep.subr.bf16.mxu1 %v1140_v0 }
  0x91   : > { %885 = vmatpush3.bf16.msra.mxu0 %v884_v41 }
  0x92   : > { %886 = vmatprep.subr.bf16.mxu0 %v1140_v0 }
  0x93   : > { %867 = vmatpush3.bf16.msra.mxu1 %v866_v23 }
  0x94   : > { %868 = vmatprep.subr.bf16.mxu1 %v1140_v0 }
  0x95   : > { %888 = vmatpush3.bf16.msra.mxu0 %v887_v44 }
  0x96   : > { %889 = vmatprep.subr.bf16.mxu0 %v1140_v0 }
  0x97   : > { %870 = vmatpush3.bf16.msra.mxu1 %v869_v26 }
  0x98   : > { %871 = vmatprep.subr.bf16.mxu1 %v1140_v0 }
  0x99   : > { %891 = vmatpush3.bf16.msra.mxu0 %v890_v47 }
  0x9a   : > { %892 = vmatprep.subr.bf16.mxu0 %v1140_v0 }
  0x9b   : > { %873 = vmatpush3.bf16.msra.mxu1 %v872_v29 }
  0x9c   : > { %874 = vmatprep.subr.bf16.mxu1 %v1140_v0 }
  0x9d   : > { %894 = vmatpush3.bf16.msra.mxu0 %v893_v50 }
  0x9e   : > { %895 = vmatprep.subr.bf16.mxu0 %v1140_v0 }
  0x9f   : > { %876 = vmatpush3.bf16.msra.mxu1 %v875_v32 }
  0xa1   : > { %897 = vmatpush3.bf16.msra.mxu0 %v896_v53 }
  0xa2   : > { %898 = vmatprep.subr.bf16.mxu0 %v1140_v0 }
  0xa5   : > { %900 = vmatpush3.bf16.msra.mxu0 %v899_v61 }
 0x15b   : > { %v420_v55 = vpop.f32.mrb[0].mxu0 }
 0x15c   : > { %v421_v56 = vadd.f32 %v721_v54, %v420_v55  ;;  %v776_v57 = vpop.f32.mrb[1].mxu0 }
 0x15e   : > { %v424_v58 = vmax.f32 %v421_v56, 0.0 }
 0x160   : > { %810 = vmatmul.mubr.f32.vlgmr.msra.gmra.mrb[0].mxu1 %v424_v58 }
 0x233   : > { %v514_v63 = vpop.f32.mrb[0].mxu1 }
 0x234   : > { %v515_v0 = vadd.f32 %v723_v62, %v514_v63  ;;  %v811_v1 = vpop.f32.mrb[1].mxu1 }
 0x236   : > { %v518_v2 = vmax.f32 %v515_v0, 0.0 }
 0x238   : > { %845 = vmatmul.mubr.f32.vlgmr.msra.gmra.mrb[2].mxu0 %v518_v2 }
 0x30b   : > { %v608_v4 = vpop.f32.mrb[2].mxu0 }
 0x30c   : > { %v609_v5 = vadd.f32 %v724_v3, %v608_v4  ;;  %v846_v6 = vpop.f32.mrb[3].mxu0 }
 0x30e   : > { %612 = vst [vmem:[%s337_s23] sm:$0xff] %v609_v5 }
 0x30f PF: > { %p19_p9 = scmp.ge.s32.totalorder %s1313_s20, 4   ;;  %s1453_s24 = smov %s1124_s25 }
 0x310   : > { %s1454_s25 = smov %s1128_s26  ;;  %s1455_s26 = smov %s1323_s11 }
 0x311   : > { %s1456_s27 = smov %s1313_s20  ;;  %21 = sbr.rel (!%p19_p9) target bundleno = 5 (0x5), region = 100 }
 0x318   :  { %632 = vsyncpa [#allocation3], 1 }
 0x319   :  { %634 = vsyncpa [#allocation3 + $0x1], 1 }
 0x31a   :  { %635 = vsyncpa [#allocation5], 1 }
 0x31b   :  { %636 = vsyncpa [#allocation8], 1 }

</bundles_post_ra>
